<compile_context>
chip_gen: v5e
topology: v5e:2x2
jax: 0.10.0
libtpu: 0.0.40
codegen_flags: <defaults>
</compile_context>

<pallas_src>
import jax
import jax.numpy as jnp
from jax.experimental import pallas as pl
from jax.experimental.pallas import tpu as pltpu

InputDim = 20
nLayers = 1
nNeurons = 20
EPS = 1e-5


def classifier_kernel(x_ref, w_in_ref, g_in_ref, b_in_ref,
                      w_hid_ref, g_hid_ref, b_hid_ref,
                      w_out_ref, b_out_ref, o_ref):
    # Feature-major: rows = features (sublanes), cols = batch (lanes).

    def bn_relu(h, gamma, beta):
        # training-mode BatchNorm1d over the batch (lane) axis, folded to 1 FMA
        mean = jnp.mean(h, axis=1, keepdims=True)                 # (nNeurons, 1)
        var = jnp.mean((h - mean) ** 2, axis=1, keepdims=True)    # (nNeurons, 1)
        scale = gamma * jax.lax.rsqrt(var + EPS)                  # EUP rsqrt
        shift = beta - mean * scale
        return jnp.maximum(h * scale + shift, 0.0)                # FMA + ReLU

    xt = x_ref[...]                                               # (InputDim, B)

    # Input block: Linear (no bias) + BN + ReLU.  W is (nNeurons, InputDim),
    # already in the right orientation for W @ X^T — no transpose needed.
    h = jnp.dot(w_in_ref[...], xt, preferred_element_type=jnp.float32)
    h = bn_relu(h, g_in_ref[...], b_in_ref[...])

    # Hidden blocks (static unroll over nLayers)
    for ii in range(nLayers):
        h = jnp.dot(w_hid_ref[ii], h, preferred_element_type=jnp.float32)
        h = bn_relu(h, g_hid_ref[ii], b_hid_ref[ii])

    # Output: Linear(nNeurons -> 1) with bias, then sigmoid.  (1, B) lane-dense.
    logits = jnp.dot(w_out_ref[...], h,
                     preferred_element_type=jnp.float32) + b_out_ref[...]
    o_ref[...] = jax.nn.sigmoid(logits)


def classifier_forward(x, params):
    (w_in, g_in, b_in, w_hid, g_hid, b_hid, w_out, b_out) = params
    B = x.shape[0]
    xt = jnp.transpose(x)          # (InputDim, B): batch on lanes, done host-side

    vmem = pl.BlockSpec(memory_space=pltpu.MemorySpace.VMEM)

    flops = 2 * B * (InputDim * nNeurons
                     + nLayers * nNeurons * nNeurons
                     + nNeurons)
    transcendentals = nNeurons * (nLayers + 1) + B        # rsqrt per BN row + sigmoid
    bytes_accessed = 4 * (B * InputDim + B                # x in, y out
                          + nNeurons * InputDim           # w_in
                          + nLayers * nNeurons * nNeurons # w_hid
                          + nNeurons + 1                  # w_out, b_out
                          + 2 * nNeurons * (nLayers + 1)) # BN gamma/beta

    out = pl.pallas_call(
        classifier_kernel,
        out_shape=jax.ShapeDtypeStruct((1, B), jnp.float32),
        in_specs=[vmem] * 9,
        out_specs=vmem,
        compiler_params=pltpu.CompilerParams(
            vmem_limit_bytes=32 * 1024 * 1024),
        cost_estimate=pl.CostEstimate(
            flops=flops,
            transcendentals=transcendentals,
            bytes_accessed=bytes_accessed),
    )(xt, w_in, g_in, b_in, w_hid, g_hid, b_hid, w_out, b_out)
    # torch.squeeze(out, dim=1) on the (B, 1) torch output == squeeze our (1, B)
    return jnp.squeeze(out, axis=0)


def init_params(key):
    k0, k1, k2, _ = jax.random.split(key, 4)
    bound_in = 1.0 / (InputDim ** 0.5)
    bound_h = 1.0 / (nNeurons ** 0.5)
    # Weights kept in PyTorch orientation (out_features, in_features) — this is
    # exactly the W @ H form needed by the feature-major kernel (no transposes).
    w_in = jax.random.uniform(k0, (nNeurons, InputDim), jnp.float32,
                              -bound_in, bound_in)
    g_in = jnp.ones((nNeurons, 1), jnp.float32)       # BN weight = 1
    b_in = jnp.zeros((nNeurons, 1), jnp.float32)      # BN bias = 0
    w_hid = jax.random.uniform(k1, (nLayers, nNeurons, nNeurons), jnp.float32,
                               -bound_h, bound_h)
    g_hid = jnp.ones((nLayers, nNeurons, 1), jnp.float32)
    b_hid = jnp.zeros((nLayers, nNeurons, 1), jnp.float32)
    w_out = jax.random.uniform(k2, (1, nNeurons), jnp.float32,
                               -bound_h, bound_h)
    b_out = jnp.zeros((1, 1), jnp.float32)            # Linear bias zeroed in __init__
    return (w_in, g_in, b_in, w_hid, g_hid, b_hid, w_out, b_out)


def reference_forward(x, params):
    (w_in, g_in, b_in, w_hid, g_hid, b_hid, w_out, b_out) = params

    def bn_relu(h, g, b):
        m = jnp.mean(h, axis=0, keepdims=True)
        v = jnp.mean((h - m) ** 2, axis=0, keepdims=True)
        return jnp.maximum((h - m) / jnp.sqrt(v + EPS) * g.T + b.T, 0.0)

    h = bn_relu(x @ w_in.T, g_in, b_in)
    for ii in range(nLayers):
        h = bn_relu(h @ w_hid[ii].T, g_hid[ii], b_hid[ii])
    return jnp.squeeze(jax.nn.sigmoid(h @ w_out.T + b_out.T), axis=1)


if __name__ == "__main__":
    key = jax.random.PRNGKey(0)
    kx, kp = jax.random.split(key)
    B = 8
    x = jax.random.normal(kx, (B, InputDim), jnp.float32)
    params = init_params(kp)

    out = classifier_forward(x, params)
    out = jax.block_until_ready(out)

    ref = reference_forward(x, params)
    assert out.shape == (B,)
    assert jnp.allclose(out, ref, atol=1e-5, rtol=1e-5)
    print("KERNEL_OK")
</pallas_src>

<mosaic_0001>
module attributes {stable_mosaic.version = 11 : i64} {
  func.func @classifier_kernel(%arg0: memref<20x8xf32, #tpu.memory_space<vmem>>, %arg1: memref<20x20xf32, #tpu.memory_space<vmem>>, %arg2: memref<20x1xf32, #tpu.memory_space<vmem>>, %arg3: memref<20x1xf32, #tpu.memory_space<vmem>>, %arg4: memref<1x20x20xf32, #tpu.memory_space<vmem>>, %arg5: memref<1x20x1xf32, #tpu.memory_space<vmem>>, %arg6: memref<1x20x1xf32, #tpu.memory_space<vmem>>, %arg7: memref<1x20xf32, #tpu.memory_space<vmem>>, %arg8: memref<1x1xf32, #tpu.memory_space<vmem>>, %arg9: memref<1x8xf32, #tpu.memory_space<vmem>>) attributes {dimension_semantics = [], scalar_prefetch = 0 : i64, scratch_operands = 0 : i64, tpu.core_type = #tpu.core_type<tc>} {
    %c0 = arith.constant 0 : index
    %c0_0 = arith.constant 0 : index
    %0 = vector.load %arg0[%c0, %c0_0] : memref<20x8xf32, #tpu.memory_space<vmem>>, vector<20x8xf32>
    %c0_1 = arith.constant 0 : index
    %c0_2 = arith.constant 0 : index
    %1 = vector.load %arg1[%c0_1, %c0_2] : memref<20x20xf32, #tpu.memory_space<vmem>>, vector<20x20xf32>
    %cst = arith.constant dense<0.000000e+00> : vector<20x8xf32>
    %2 = tpu.matmul %1, %0, %cst {dimension_numbers = #tpu.dot_dimension_numbers<[1], [0], [0], [1], [0, 0, 1, 1], [], []>} : vector<20x20xf32>, vector<20x8xf32>, vector<20x8xf32> -> vector<20x8xf32>
    %c0_3 = arith.constant 0 : index
    %c0_4 = arith.constant 0 : index
    %3 = vector.load %arg2[%c0_3, %c0_4] : memref<20x1xf32, #tpu.memory_space<vmem>>, vector<20x1xf32>
    %c0_5 = arith.constant 0 : index
    %c0_6 = arith.constant 0 : index
    %4 = vector.load %arg3[%c0_5, %c0_6] : memref<20x1xf32, #tpu.memory_space<vmem>>, vector<20x1xf32>
    %cst_7 = arith.constant dense<0.000000e+00> : vector<20xf32>
    %5 = vector.multi_reduction <add>, %2, %cst_7 [1] : vector<20x8xf32> to vector<20xf32>
    %6 = vector.shape_cast %5 : vector<20xf32> to vector<20x1xf32>
    %cst_8 = arith.constant 8.000000e+00 : f32
    %7 = vector.broadcast %cst_8 : f32 to vector<20x1xf32>
    %8 = arith.divf %6, %7 : vector<20x1xf32>
    %9 = vector.broadcast %8 : vector<20x1xf32> to vector<20x8xf32>
    %10 = arith.subf %2, %9 : vector<20x8xf32>
    %11 = arith.mulf %10, %10 : vector<20x8xf32>
    %cst_9 = arith.constant dense<0.000000e+00> : vector<20xf32>
    %12 = vector.multi_reduction <add>, %11, %cst_9 [1] : vector<20x8xf32> to vector<20xf32>
    %13 = vector.shape_cast %12 : vector<20xf32> to vector<20x1xf32>
    %cst_10 = arith.constant 8.000000e+00 : f32
    %14 = vector.broadcast %cst_10 : f32 to vector<20x1xf32>
    %15 = arith.divf %13, %14 : vector<20x1xf32>
    %cst_11 = arith.constant 9.99999974E-6 : f32
    %16 = vector.broadcast %cst_11 : f32 to vector<20x1xf32>
    %17 = arith.addf %15, %16 : vector<20x1xf32>
    %18 = math.rsqrt %17 : vector<20x1xf32>
    %19 = arith.mulf %3, %18 : vector<20x1xf32>
    %20 = arith.mulf %8, %19 : vector<20x1xf32>
    %21 = arith.subf %4, %20 : vector<20x1xf32>
    %22 = vector.broadcast %19 : vector<20x1xf32> to vector<20x8xf32>
    %23 = arith.mulf %2, %22 : vector<20x8xf32>
    %24 = vector.broadcast %21 : vector<20x1xf32> to vector<20x8xf32>
    %25 = arith.addf %23, %24 : vector<20x8xf32>
    %cst_12 = arith.constant 0.000000e+00 : f32
    %26 = vector.broadcast %cst_12 : f32 to vector<20x8xf32>
    %27 = arith.maximumf %25, %26 : vector<20x8xf32>
    %c0_13 = arith.constant 0 : index
    %c0_14 = arith.constant 0 : index
    %c0_15 = arith.constant 0 : index
    %28 = vector.load %arg4[%c0_13, %c0_14, %c0_15] : memref<1x20x20xf32, #tpu.memory_space<vmem>>, vector<1x20x20xf32>
    %29 = vector.shape_cast %28 : vector<1x20x20xf32> to vector<20x20xf32>
    %cst_16 = arith.constant dense<0.000000e+00> : vector<20x8xf32>
    %30 = tpu.matmul %29, %27, %cst_16 {dimension_numbers = #tpu.dot_dimension_numbers<[1], [0], [0], [1], [0, 0, 1, 1], [], []>} : vector<20x20xf32>, vector<20x8xf32>, vector<20x8xf32> -> vector<20x8xf32>
    %c0_17 = arith.constant 0 : index
    %c0_18 = arith.constant 0 : index
    %c0_19 = arith.constant 0 : index
    %31 = vector.load %arg5[%c0_17, %c0_18, %c0_19] : memref<1x20x1xf32, #tpu.memory_space<vmem>>, vector<1x20x1xf32>
    %32 = vector.shape_cast %31 : vector<1x20x1xf32> to vector<20x1xf32>
    %c0_20 = arith.constant 0 : index
    %c0_21 = arith.constant 0 : index
    %c0_22 = arith.constant 0 : index
    %33 = vector.load %arg6[%c0_20, %c0_21, %c0_22] : memref<1x20x1xf32, #tpu.memory_space<vmem>>, vector<1x20x1xf32>
    %34 = vector.shape_cast %33 : vector<1x20x1xf32> to vector<20x1xf32>
    %cst_23 = arith.constant dense<0.000000e+00> : vector<20xf32>
    %35 = vector.multi_reduction <add>, %30, %cst_23 [1] : vector<20x8xf32> to vector<20xf32>
    %36 = vector.shape_cast %35 : vector<20xf32> to vector<20x1xf32>
    %cst_24 = arith.constant 8.000000e+00 : f32
    %37 = vector.broadcast %cst_24 : f32 to vector<20x1xf32>
    %38 = arith.divf %36, %37 : vector<20x1xf32>
    %39 = vector.broadcast %38 : vector<20x1xf32> to vector<20x8xf32>
    %40 = arith.subf %30, %39 : vector<20x8xf32>
    %41 = arith.mulf %40, %40 : vector<20x8xf32>
    %cst_25 = arith.constant dense<0.000000e+00> : vector<20xf32>
    %42 = vector.multi_reduction <add>, %41, %cst_25 [1] : vector<20x8xf32> to vector<20xf32>
    %43 = vector.shape_cast %42 : vector<20xf32> to vector<20x1xf32>
    %cst_26 = arith.constant 8.000000e+00 : f32
    %44 = vector.broadcast %cst_26 : f32 to vector<20x1xf32>
    %45 = arith.divf %43, %44 : vector<20x1xf32>
    %cst_27 = arith.constant 9.99999974E-6 : f32
    %46 = vector.broadcast %cst_27 : f32 to vector<20x1xf32>
    %47 = arith.addf %45, %46 : vector<20x1xf32>
    %48 = math.rsqrt %47 : vector<20x1xf32>
    %49 = arith.mulf %32, %48 : vector<20x1xf32>
    %50 = arith.mulf %38, %49 : vector<20x1xf32>
    %51 = arith.subf %34, %50 : vector<20x1xf32>
    %52 = vector.broadcast %49 : vector<20x1xf32> to vector<20x8xf32>
    %53 = arith.mulf %30, %52 : vector<20x8xf32>
    %54 = vector.broadcast %51 : vector<20x1xf32> to vector<20x8xf32>
    %55 = arith.addf %53, %54 : vector<20x8xf32>
    %cst_28 = arith.constant 0.000000e+00 : f32
    %56 = vector.broadcast %cst_28 : f32 to vector<20x8xf32>
    %57 = arith.maximumf %55, %56 : vector<20x8xf32>
    %c0_29 = arith.constant 0 : index
    %c0_30 = arith.constant 0 : index
    %58 = vector.load %arg7[%c0_29, %c0_30] : memref<1x20xf32, #tpu.memory_space<vmem>>, vector<1x20xf32>
    %cst_31 = arith.constant dense<0.000000e+00> : vector<1x8xf32>
    %59 = tpu.matmul %58, %57, %cst_31 {dimension_numbers = #tpu.dot_dimension_numbers<[1], [0], [0], [1], [0, 0, 1, 1], [], []>} : vector<1x20xf32>, vector<20x8xf32>, vector<1x8xf32> -> vector<1x8xf32>
    %c0_32 = arith.constant 0 : index
    %c0_33 = arith.constant 0 : index
    %60 = vector.load %arg8[%c0_32, %c0_33] : memref<1x1xf32, #tpu.memory_space<vmem>>, vector<1x1xf32>
    %61 = vector.broadcast %60 : vector<1x1xf32> to vector<1x8xf32>
    %62 = arith.addf %59, %61 : vector<1x8xf32>
    %63 = arith.negf %62 : vector<1x8xf32>
    %64 = math.exp %63 : vector<1x8xf32>
    %cst_34 = arith.constant 1.000000e+00 : f32
    %65 = vector.broadcast %cst_34 : f32 to vector<1x8xf32>
    %66 = arith.addf %65, %64 : vector<1x8xf32>
    %67 = arith.divf %65, %66 : vector<1x8xf32>
    %c0_35 = arith.constant 0 : index
    %c0_36 = arith.constant 0 : index
    %68 = vector.load %arg9[%c0_35, %c0_36] : memref<1x8xf32, #tpu.memory_space<vmem>>, vector<1x8xf32>
    tpu.vector_store %arg9[%c0_35, %c0_36], %67 {strides = array<i32>} : memref<1x8xf32, #tpu.memory_space<vmem>>, vector<1x8xf32>,
    return
  }
}

</mosaic_0001>

<bundles_post_ra>
// kernel: tpu_custom_call.1
= control target key start
LH: loop header
LB: loop body
LE: loop exit
PB: predicated region body
PF: predicated region fallthrough
CT: control target
= control target key end

     0   :  { %s708_s0 = inlined_call_operand.vmem [shape: f32[20,8], index: 0, kind: input, shape index: {}]   ;;  %s709_s1 = inlined_call_operand.vmem [shape: f32[20,20], index: 1, kind: input, shape index: {}]   ;;  %s710_s2 = inlined_call_operand.vmem [shape: f32[20,1], index: 2, kind: input, shape index: {}]   ;;  %s711_s3 = inlined_call_operand.vmem [shape: f32[20,1], index: 3, kind: input, shape index: {}]   ;;  %s712_s4 = inlined_call_operand.vmem [shape: f32[1,20,20], index: 4, kind: input, shape index: {}]   ;;  %s713_s5 = inlined_call_operand.vmem [shape: f32[1,20,1], index: 5, kind: input, shape index: {}]   ;;  %s714_s6 = inlined_call_operand.vmem [shape: f32[1,20,1], index: 6, kind: input, shape index: {}]   ;;  %s715_s7 = inlined_call_operand.vmem [shape: f32[1,20], index: 7, kind: input, shape index: {}]   ;;  %s716_s8 = inlined_call_operand.<no memory space> [shape: f32[1,1], index: 8, kind: input, shape index: {}]   ;;  %s717_s9 = inlined_call_operand.hbm [shape: f32[1,8], index: 9, kind: output, shape index: {}]  }
   0x1   :  { %v14_v0 = vstv %s716_s8 }
   0x2   :  { %15 = vst [vmem:[#allocation2] sm:$0x1] %v14_v0 }
   0x3   :  { %v37_v1 = vld [vmem:[%s708_s0 + $0x10] sm:$0xf]  ;;  %vm51_vm0 = vcmask 1043456   ;;  %v36_v2 = vld [vmem:[%s708_s0 + $0x8] sm:$0xff]  ;;  %v35_v3 = vld [vmem:[%s708_s0] sm:$0xff] }
   0x4   :  { %436 = vmatpush.msk.msra.mxu0 %vm51_vm0, %v37_v1  ;;  %447 = vmatpush.msk.msra.mxu3 %vm51_vm0, %v37_v1 }
   0x5   :  { %16 = vsyncpa [#allocation4], 0  ;;  %v38_v4 = vld [vmem:[%s709_s1] sm:$0xff]  ;;  %vm41_vm1 = vcmask 162816   ;;  %v39_v5 = vld [vmem:[%s709_s1 + $0x8] sm:$0xff]  ;;  %vm87_vm2 = vcmask 64512  }
   0x6   :  { %69 = vmatpush.msra.mxu0 %v36_v2  ;;  %448 = vmatpush.msra.mxu3 %v36_v2  ;;  %v40_v6 = vld [vmem:[%s709_s1 + $0x10] sm:$0xf]  ;;  %vm94_vm3 = vcmask 60416   ;;  %v503_v13 = vmov 8.0   ;;  %v504_v35 = vmov 0   ;;  %v82_v61 = vld [vmem:[%s710_s2 + $0x8] sm:$0xff] }
   0x7   :  { %459 = vrcp.f32 %v503_v13  ;;  %456 = vset.pattern.permute.xlu0 %v504_v35  ;;  %457 = vset.pattern.permute.xlu1 %v504_v35  ;;  %v83_v52 = vld [vmem:[%s710_s2 + $0x10] sm:$0xf]  ;;  %s427_s26 = sshll.u32 %s717_s9, 4  ;;  %s428_s26 = int_to_ptr.hbm [resolvable:$true] %s427_s26 }
   0x8   :  { %70 = vmatpush.msra.mxu0 %v35_v3  ;;  %449 = vmatpush.msra.mxu3 %v35_v3 }
   0x9   :  { %437 = vmatmul.msk.f32.vlgmr.msra.gmra.mxu0 %vm41_vm1, %v38_v4  ;;  %438 = vmatmul.msk.f32.vlgmr.msra.gmra.mxu3 %vm41_vm1, %v39_v5  ;;  %v85_v5 = vld [vmem:[%s711_s3 + $0x8] sm:$0xff] }
   0xa   :  { %458 = vset.pattern.permute.xlu2 %v504_v35 }
   0xd   :  { %v460_v14 = vpop.eup %459 }
   0xe   :  { %v99_v15 = vmul.f32 8.0, %v460_v14  ;;  %vm103_vm4 = vweird.f32 %v460_v14 }
  0x10   :  { %v100_v16 = vsub.f32 1.0, %v99_v15  ;;  %v86_v15 = vld [vmem:[%s711_s3 + $0x10] sm:$0xf] }
  0x11   :  { %439 = vmatmul.msk.f32.gmra.mxu3 %vm41_vm1, %v40_v6  ;;  %v81_v6 = vld [vmem:[%s710_s2] sm:$0xff] }
  0x12   :  { %v101_v17 = vmul.f32 %v460_v14, %v100_v16 }
  0x14   :  { %v102_v18 = vadd.f32 %v460_v14, %v101_v17 }
  0x16   :  { %v594_v19 = vsel %vm103_vm4, %v460_v14, %v102_v18  ;;  %v84_v18 = vld [vmem:[%s711_s3] sm:$0xff] }
  0x86   :  { %v582_v7 = vpop.f32.mrf.mxu0 }
  0x87   :  { %v88_v8 = vsel %vm87_vm2, %v582_v7, 0.0 }
  0x88   :  { %89 = vadd.xlane.f32.xlu1 %v88_v8 }
  0x8c   :  { %v586_v9 = vpop.f32.mrf.mxu3 }
  0x8d   :  { %v91_v12 = vsel %vm87_vm2, %v586_v9, 0.0 }
  0x94   :  { %v588_v10 = vpop.f32.mrf.mxu3 }
  0x95   :  { %v95_v11 = vsel %vm94_vm3, %v588_v10, 0.0 }
  0x96   :  { %96 = vadd.xlane.f32.xlu0 %v95_v11 }
  0x9e   :  { %92 = vadd.xlane.f32.xlu0 %v91_v12 }
  0xfb   :  { %v90_v25 = vpop.xlane.xlu1 %89 }
  0xfc   :  { %v604_v28 = vmul.f32 %v594_v19, %v90_v25 }
  0xfe   :  { %v108_v31 = vsub.f32 %v582_v7, %v604_v28 }
 0x100   :  { %v111_v33 = vmul.f32 %v108_v31, %v108_v31 }
 0x102   :  { %v114_v34 = vsel %vm87_vm2, %v111_v33, 0.0 }
 0x109   :  { %v97_v20 = vpop.xlane.xlu0 %96 }
 0x10a   :  { %v597_v21 = vmul.f32 %v594_v19, %v97_v20 }
 0x10c   :  { %v110_v22 = vsub.f32 %v588_v10, %v597_v21 }
 0x10e   :  { %v113_v23 = vmul.f32 %v110_v22, %v110_v22 }
 0x110   :  { %v120_v24 = vsel %vm94_vm3, %v113_v23, 0.0 }
 0x111   :  { %v93_v26 = vpop.xlane.xlu0 %92  ;;  %121 = vadd.xlane.f32.xlu1 %v120_v24 }
 0x112   :  { %v106_v27 = vmul.f32 %v594_v19, %v93_v26 }
 0x114   :  { %v109_v29 = vsub.f32 %v586_v9, %v106_v27 }
 0x116   :  { %v112_v30 = vmul.f32 %v109_v29, %v109_v29 }
 0x118   :  { %v117_v32 = vsel %vm87_vm2, %v112_v30, 0.0 }
 0x119   :  { %118 = vadd.xlane.f32.xlu2 %v117_v32 }
 0x121   :  { %115 = vadd.xlane.f32.xlu2 %v114_v34 }
 0x184   :  { %v122_v36 = vpop.xlane.xlu1 %121 }
 0x185   :  { %v125_v37 = vmul.f32 %v122_v36, %v594_v19  ;;  %v208_v36 = vld [vmem:[%s712_s4 + $0x8] sm:$0xff] }
 0x187   :  { %v128_v38 = vadd.f32 1e-05, %v125_v37 }
 0x189   :  { %461 = vrsqrt.f32 %v128_v38  ;;  %vm155_vm6 = vweird.f32 %v128_v38 }
 0x18c   :  { %v119_v39 = vpop.xlane.xlu2 %118 }
 0x18d   :  { %v124_v40 = vmul.f32 %v119_v39, %v594_v19 }
 0x18f   :  { %v462_v41 = vpop.eup %461  ;;  %v127_v42 = vadd.f32 1e-05, %v124_v40 }
 0x190   :  { %v150_v43 = vmul.f32 %v462_v41, %v128_v38  ;;  %vm156_vm5 = vweird.f32 %v462_v41 }
 0x191   :  { %463 = vrsqrt.f32 %v127_v42  ;;  %vm157_vm7 = vmor %vm155_vm6, %vm156_vm5  ;;  %vm145_vm9 = vweird.f32 %v127_v42 }
 0x192   :  { %v151_v44 = vmul.f32 %v462_v41, %v150_v43 }
 0x194   :  { %v152_v45 = vmul.f32 0.5, %v151_v44  ;;  %v116_v46 = vpop.xlane.xlu2 %115 }
 0x195   :  { %v123_v47 = vmul.f32 %v116_v46, %v594_v19 }
 0x196   :  { %v153_v48 = vsub.f32 1.5, %v152_v45 }
 0x197   :  { %v464_v49 = vpop.eup %463  ;;  %v126_v50 = vadd.f32 1e-05, %v123_v47 }
 0x198   :  { %v140_v51 = vmul.f32 %v464_v49, %v127_v42  ;;  %v154_v53 = vmul.f32 %v462_v41, %v153_v48  ;;  %vm146_vm8 = vweird.f32 %v464_v49 }
 0x199   :  { %465 = vrsqrt.f32 %v126_v50  ;;  %vm147_vm10 = vmor %vm145_vm9, %vm146_vm8  ;;  %vm135_vm12 = vweird.f32 %v126_v50 }
 0x19a   :  { %v141_v54 = vmul.f32 %v464_v49, %v140_v51  ;;  %v158_v55 = vsel %vm157_vm7, %v462_v41, %v154_v53 }
 0x19b   :  { %v161_v56 = vmul.f32 %v158_v55, %v83_v52 }
 0x19c   :  { %v142_v57 = vmul.f32 0.5, %v141_v54 }
 0x19d   :  { %180 = vperm.xlu0 %456, %v161_v56   ;;  %v164_v14 = vmul.f32 %v161_v56, %v597_v21 }
 0x19e   :  { %v143_v58 = vsub.f32 1.5, %v142_v57 }
 0x19f   :  { %v466_v59 = vpop.eup %465  ;;  %v167_v16 = vsub.f32 %v86_v15, %v164_v14 }
 0x1a0   :  { %v130_v60 = vmul.f32 %v466_v59, %v126_v50  ;;  %v144_v62 = vmul.f32 %v464_v49, %v143_v58  ;;  %vm136_vm11 = vweird.f32 %v466_v59 }
 0x1a1   :  { %vm137_vm13 = vmor %vm135_vm12, %vm136_vm11 }
 0x1a2   :  { %v131_v63 = vmul.f32 %v466_v59, %v130_v60  ;;  %v148_v0 = vsel %vm147_vm10, %v464_v49, %v144_v62  ;;  %vm418_vm10 = vcmask 57344  }
 0x1a3   :  { %v160_v1 = vmul.f32 %v148_v0, %v82_v61 }
 0x1a4   :  { %v132_v2 = vmul.f32 0.5, %v131_v63 }
 0x1a5   :  { %175 = vperm.xlu1 %457, %v160_v1   ;;  %v163_v4 = vmul.f32 %v160_v1, %v106_v27 }
 0x1a6   :  { %v133_v3 = vsub.f32 1.5, %v132_v2 }
 0x1a7   :  { %v166_v12 = vsub.f32 %v85_v5, %v163_v4 }
 0x1a8   :  { %v134_v8 = vmul.f32 %v466_v59, %v133_v3 }
 0x1aa   :  { %v138_v11 = vsel %vm137_vm13, %v466_v59, %v134_v8 }
 0x1ab   :  { %v159_v13 = vmul.f32 %v138_v11, %v81_v6 }
 0x1ad   :  { %193 = vperm.xlu1 %457, %v166_v12   ;;  %170 = vperm.xlu2 %458, %v159_v13   ;;  %v162_v17 = vmul.f32 %v159_v13, %v604_v28 }
 0x1af   :  { %v165_v20 = vsub.f32 %v84_v18, %v162_v17 }
 0x1b5   :  { %198 = vperm.xlu2 %458, %v167_v16  }
 0x1bd   :  { %188 = vperm.xlu2 %458, %v165_v20   ;;  %v248_v20 = vld [vmem:[%s713_s5] sm:$0xff] }
 0x207   :  { %v171_v22 = vpop.permute.xlu2 %170 }
 0x208   :  { %v183_v28 = vmul.f32 %v171_v22, %v582_v7  ;;  %v209_v7 = vld [vmem:[%s712_s4 + $0x10] sm:$0xf] }
 0x20f   :  { %v181_v23 = vpop.permute.xlu0 %180  ;;  %v199_v25 = vpop.permute.xlu2 %198 }
 0x210   :  { %v185_v24 = vmul.f32 %v181_v23, %v588_v10  ;;  %v207_v10 = vld [vmem:[%s712_s4] sm:$0xff] }
 0x212   :  { %v203_v21 = vadd.f32 %v199_v25, %v185_v24 }
 0x214   :  { %v206_v26 = vmax.f32 %v203_v21, 0.0 }
 0x216   :  { %440 = vmatpush.msk.msrb.mxu0 %vm51_vm0, %v206_v26  ;;  %450 = vmatpush.msk.msra.mxu1 %vm51_vm0, %v206_v26 }
 0x217   :  { %v176_v27 = vpop.permute.xlu1 %175  ;;  %v189_v29 = vpop.permute.xlu2 %188 }
 0x218   :  { %v184_v30 = vmul.f32 %v176_v27, %v586_v9  ;;  %v201_v32 = vadd.f32 %v189_v29, %v183_v28  ;;  %v250_v29 = vld [vmem:[%s713_s5 + $0x10] sm:$0xf] }
 0x21a   :  { %v204_v35 = vmax.f32 %v201_v32, 0.0 }
 0x21f   :  { %v194_v31 = vpop.permute.xlu1 %193 }
 0x220   :  { %v202_v33 = vadd.f32 %v194_v31, %v184_v30  ;;  %v251_v31 = vld [vmem:[%s714_s6] sm:$0xff] }
 0x222   :  { %v205_v34 = vmax.f32 %v202_v33, 0.0 }
 0x224   :  { %236 = vmatpush.msrb.mxu0 %v205_v34  ;;  %451 = vmatpush.msra.mxu1 %v205_v34 }
 0x226   :  { %237 = vmatpush.msrb.mxu0 %v204_v35  ;;  %452 = vmatpush.msra.mxu1 %v204_v35  ;;  %v253_v35 = vld [vmem:[%s714_s6 + $0x10] sm:$0xf] }
 0x227   :  { %441 = vmatmul.msk.f32.vlgmr.msrb.gmra.mxu0 %vm41_vm1, %v207_v10  ;;  %442 = vmatmul.msk.f32.vlgmr.msra.gmra.mxu1 %vm41_vm1, %v208_v36 }
 0x22f   :  { %443 = vmatmul.msk.f32.gmra.mxu1 %vm41_vm1, %v209_v7 }
 0x2a4   :  { %v651_v9 = vpop.f32.mrf.mxu0  ;;  %v653_v37 = vpop.f32.mrf.mxu1 }
 0x2a5   :  { %v257_v38 = vsel %vm87_vm2, %v653_v37, 0.0  ;;  %v254_v39 = vsel %vm87_vm2, %v651_v9, 0.0 }
 0x2a6   :  { %258 = vadd.xlane.f32.xlu0 %v257_v38  ;;  %255 = vadd.xlane.f32.xlu2 %v254_v39  ;;  %v252_v38 = vld [vmem:[%s714_s6 + $0x8] sm:$0xff] }
 0x2ac   :  { %v659_v40 = vpop.f32.mrf.mxu1 }
 0x2ad   :  { %v260_v41 = vsel %vm94_vm3, %v659_v40, 0.0 }
 0x2ae   :  { %261 = vadd.xlane.f32.xlu1 %v260_v41  ;;  %v366_v41 = vld [vmem:[#allocation2] sm:$0x1] }
 0x319   :  { %v259_v42 = vpop.xlane.xlu0 %258  ;;  %v256_v43 = vpop.xlane.xlu2 %255 }
 0x31a   :  { %v664_v44 = vmul.f32 %v259_v42, %v594_v19  ;;  %v263_v45 = vmul.f32 %v256_v43, %v594_v19 }
 0x31c   :  { %v267_v46 = vsub.f32 %v653_v37, %v664_v44  ;;  %v266_v47 = vsub.f32 %v651_v9, %v263_v45 }
 0x31e   :  { %v270_v48 = vmul.f32 %v267_v46, %v267_v46  ;;  %v269_v49 = vmul.f32 %v266_v47, %v266_v47 }
 0x320   :  { %v275_v50 = vsel %vm87_vm2, %v270_v48, 0.0  ;;  %v272_v51 = vsel %vm87_vm2, %v269_v49, 0.0 }
 0x321   :  { %v262_v52 = vpop.xlane.xlu1 %261  ;;  %276 = vadd.xlane.f32.xlu2 %v275_v50  ;;  %273 = vadd.xlane.f32.xlu0 %v272_v51 }
 0x322   :  { %v265_v53 = vmul.f32 %v262_v52, %v594_v19 }
 0x324   :  { %v268_v54 = vsub.f32 %v659_v40, %v265_v53 }
 0x326   :  { %v271_v55 = vmul.f32 %v268_v54, %v268_v54 }
 0x328   :  { %v278_v56 = vsel %vm94_vm3, %v271_v55, 0.0 }
 0x329   :  { %279 = vadd.xlane.f32.xlu1 %v278_v56 }
 0x394   :  { %v274_v57 = vpop.xlane.xlu0 %273  ;;  %v277_v58 = vpop.xlane.xlu2 %276 }
 0x395   :  { %v281_v59 = vmul.f32 %v274_v57, %v594_v19  ;;  %v282_v60 = vmul.f32 %v277_v58, %v594_v19 }
 0x397   :  { %v284_v61 = vadd.f32 1e-05, %v281_v59  ;;  %v285_v62 = vadd.f32 1e-05, %v282_v60 }
 0x399   :  { %467 = vrsqrt.f32 %v284_v61  ;;  %vm293_vm2 = vweird.f32 %v284_v61  ;;  %vm303_vm4 = vweird.f32 %v285_v62 }
 0x39a   :  { %469 = vrsqrt.f32 %v285_v62 }
 0x39c   :  { %v280_v63 = vpop.xlane.xlu1 %279 }
 0x39d   :  { %v283_v0 = vmul.f32 %v280_v63, %v594_v19  ;;  %v249_v19 = vld [vmem:[%s713_s5 + $0x8] sm:$0xff] }
 0x39f   :  { %v468_v1 = vpop.eup %467  ;;  %v286_v2 = vadd.f32 1e-05, %v283_v0 }
 0x3a0   :  { %v470_v3 = vpop.eup %469  ;;  %v288_v4 = vmul.f32 %v468_v1, %v284_v61  ;;  %vm294_vm14 = vweird.f32 %v468_v1 }
 0x3a1   :  { %v298_v5 = vmul.f32 %v470_v3, %v285_v62  ;;  %471 = vrsqrt.f32 %v286_v2  ;;  %vm304_vm15 = vweird.f32 %v470_v3  ;;  %vm295_vm3 = vmor %vm293_vm2, %vm294_vm14  ;;  %vm313_vm7 = vweird.f32 %v286_v2 }
 0x3a2   :  { %v289_v6 = vmul.f32 %v468_v1, %v288_v4  ;;  %vm305_vm5 = vmor %vm303_vm4, %vm304_vm15 }
 0x3a3   :  { %v299_v8 = vmul.f32 %v470_v3, %v298_v5 }
 0x3a4   :  { %v290_v11 = vmul.f32 0.5, %v289_v6 }
 0x3a5   :  { %v300_v12 = vmul.f32 0.5, %v299_v8 }
 0x3a6   :  { %v291_v13 = vsub.f32 1.5, %v290_v11 }
 0x3a7   :  { %v472_v14 = vpop.eup %471  ;;  %v301_v15 = vsub.f32 1.5, %v300_v12 }
 0x3a8   :  { %v292_v16 = vmul.f32 %v468_v1, %v291_v13  ;;  %v308_v17 = vmul.f32 %v472_v14, %v286_v2  ;;  %vm314_vm6 = vweird.f32 %v472_v14 }
 0x3a9   :  { %v302_v18 = vmul.f32 %v470_v3, %v301_v15  ;;  %vm315_vm8 = vmor %vm313_vm7, %vm314_vm6 }
 0x3aa   :  { %v296_v22 = vsel %vm295_vm3, %v468_v1, %v292_v16  ;;  %v309_v23 = vmul.f32 %v472_v14, %v308_v17 }
 0x3ab   :  { %v306_v24 = vsel %vm305_vm5, %v470_v3, %v302_v18  ;;  %v317_v26 = vmul.f32 %v296_v22, %v248_v20 }
 0x3ac   :  { %v310_v25 = vmul.f32 0.5, %v309_v23  ;;  %v318_v21 = vmul.f32 %v306_v24, %v249_v19 }
 0x3ad   :  { %v320_v30 = vmul.f32 %v317_v26, %v263_v45 }
 0x3ae   :  { %v311_v27 = vsub.f32 1.5, %v310_v25  ;;  %333 = vperm.xlu2 %458, %v318_v21   ;;  %v321_v7 = vmul.f32 %v318_v21, %v664_v44 }
 0x3af   :  { %v323_v34 = vsub.f32 %v251_v31, %v320_v30 }
 0x3b0   :  { %v312_v28 = vmul.f32 %v472_v14, %v311_v27  ;;  %v324_v39 = vsub.f32 %v252_v38, %v321_v7 }
 0x3b2   :  { %v316_v32 = vsel %vm315_vm8, %v472_v14, %v312_v28 }
 0x3b3   :  { %v319_v33 = vmul.f32 %v316_v32, %v250_v29 }
 0x3b5   :  { %338 = vperm.xlu1 %457, %v319_v33   ;;  %v322_v10 = vmul.f32 %v319_v33, %v265_v53 }
 0x3b6   :  { %346 = vperm.xlu2 %458, %v323_v34  }
 0x3b7   :  { %v325_v36 = vsub.f32 %v253_v35, %v322_v10 }
 0x3b9   :  { %356 = vperm.xlu0 %456, %v325_v36  }
 0x3bd   :  { %328 = vperm.xlu1 %457, %v317_v26  }
 0x3c1   :  { %351 = vperm.xlu0 %456, %v324_v39  }
 0x3c5   :  { %369 = vperm.xlu1 %457, %v366_v41  }
 0x408   :  { %v334_v43 = vpop.permute.xlu2 %333 }
 0x409   :  { %v342_v44 = vmul.f32 %v334_v43, %v653_v37 }
 0x410   :  { %v347_v51 = vpop.permute.xlu2 %346 }
 0x427   :  { %v339_v42 = vpop.permute.xlu1 %338 }
 0x428   :  { %v343_v45 = vmul.f32 %v339_v42, %v659_v40  ;;  %v365_v40 = vld [vmem:[%s715_s7] sm:$0x1]  ;;  %s505_s7 = smov [#allocation3]  }
 0x429   :  { %s425_s23 = sshll.u32 %s505_s7, 4  ;;  %s426_s23 = int_to_ptr.vmem [resolvable:$true] %s425_s23 }
 0x42b   :  { %v357_v46 = vpop.permute.xlu0 %356 }
 0x42c   :  { %v361_v47 = vadd.f32 %v357_v46, %v343_v45 }
 0x42e   :  { %v364_v48 = vmax.f32 %v361_v47, 0.0 }
 0x42f   :  { %v329_v49 = vpop.permute.xlu1 %328 }
 0x430   :  { %v341_v50 = vmul.f32 %v329_v49, %v651_v9  ;;  %444 = vmatpush.msk.msra.mxu2 %vm51_vm0, %v364_v48 }
 0x432   :  { %v359_v54 = vadd.f32 %v347_v51, %v341_v50 }
 0x433   :  { %v352_v52 = vpop.permute.xlu0 %351 }
 0x434   :  { %v360_v53 = vadd.f32 %v352_v52, %v342_v44  ;;  %v362_v56 = vmax.f32 %v359_v54, 0.0 }
 0x436   :  { %v363_v55 = vmax.f32 %v360_v53, 0.0 }
 0x437   :  { %v370_v57 = vpop.permute.xlu1 %369 }
 0x438   :  { %393 = vmatpush.msra.mxu2 %v363_v55  ;;  %v372_v9 = vperm.slane %v370_v57, 0 }
 0x43a   :  { %394 = vmatpush.msra.mxu2 %v362_v56 }
 0x43b   :  { %445 = vmatmul.msk.f32.vlgmr.msra.gmra.mxu2 %vm41_vm1, %v365_v40 }
 0x4be   :  { %v396_v58 = vpop.f32.mrf.mxu2 }
 0x4bf   :  { %v397_v59 = vadd.f32 %v396_v58, %v372_v9 }
 0x4c1   :  { %v446_v60 = vmul.f32 -1.442695, %v397_v59 }
 0x4c3   :  { %473 = vpow2.f32 %v446_v60 }
 0x4c9   :  { %v474_v37 = vpop.eup %473 }
 0x4ca   :  { %v402_v61 = vadd.f32 1.0, %v474_v37 }
 0x4cc   :  { %475 = vrcp.f32 %v402_v61  ;;  %v414_v1 = vand.u32 2147483648, %v402_v61  ;;  %v412_v3 = vand.u32 2147483647, %v402_v61  ;;  %vm408_vm1 = vweird.f32 %v402_v61 }
 0x4ce   :  { %v415_v5 = vor.u32 1.1754944e-38, %v414_v1  ;;  %vm413_vm11 = vcmp.eq.f32.partialorder %v412_v3, 8.507059e+37 }
 0x4d2   :  { %v476_v62 = vpop.eup %475 }
 0x4d3   :  { %v404_v63 = vmul.f32 %v476_v62, %v402_v61  ;;  %vm409_vm0 = vweird.f32 %v476_v62 }
 0x4d4   :  { %vm410_vm9 = vmor %vm408_vm1, %vm409_vm0 }
 0x4d5   :  { %v405_v0 = vsub.f32 1.0, %v404_v63 }
 0x4d7   :  { %v406_v2 = vmul.f32 %v476_v62, %v405_v0 }
 0x4d9   :  { %v407_v4 = vadd.f32 %v476_v62, %v406_v2 }
 0x4db   :  { %v411_v6 = vsel %vm410_vm9, %v476_v62, %v407_v4 }
 0x4dc   :  { %v416_v8 = vsel %vm413_vm11, %v415_v5, %v411_v6 }
 0x4dd   :  { %419 = vst.msk [vmem:[#allocation3] sm:$0x1] %vm418_vm10, %v416_v8 }
 0x4de   :  { %430 = dma.vmem_to_hbm [thread:$0]  %s426_s23, 16, %s428_s26, [#allocation4]  }
 0x4df   :  { %501 = dma.done.wait [#allocation4], 16  }
 0x4e0   :  { %502 = vsyncadd [#allocation4], 4294967280 }
 0x4e1   :  { %435 = vsyncpa [#allocation4], 1 }

</bundles_post_ra>
